<compile_context>
chip_gen: v6e
topology: v6e:2x2x1
jax: 0.10.0
libtpu: 0.0.40
codegen_flags: <defaults>
</compile_context>

<pallas_src>
import functools

import jax
import jax.numpy as jnp
import numpy as np
from jax.experimental import pallas as pl
from jax.experimental.pallas import tpu as pltpu


# -----------------------------------------------------------------------------
# Small helpers
# -----------------------------------------------------------------------------
def _tile_concat(x, reps, axis):
    """concat([x] * reps, axis), built by doubling (all copies are identical)."""
    if reps == 1:
        return x
    out, built = x, 1
    while built * 2 <= reps:
        out = jnp.concatenate([out, out], axis=axis)
        built *= 2
    rem = reps - built
    if rem:
        out = jnp.concatenate([out] + [x] * rem, axis=axis)
    return out


def _unfold2d(x, K, S):
    """torch-style unfold over the last two dims: (..., H, W) -> (..., F, F, K, K).

    result[..., f1, f2, k1, k2] = x[..., f1*S + k1, f2*S + k2]
    """
    H, W = x.shape[-2:]
    Fh = (H - K) // S + 1
    Fw = (W - K) // S + 1
    idx_h = (jnp.arange(Fh) * S)[:, None] + jnp.arange(K)[None, :]   # (Fh, K)
    idx_w = (jnp.arange(Fw) * S)[:, None] + jnp.arange(K)[None, :]   # (Fw, K)
    x = jnp.take(x, idx_h.reshape(-1), axis=-2)                       # (..., Fh*K, W)
    x = x.reshape(x.shape[:-2] + (Fh, K, W))
    x = jnp.take(x, idx_w.reshape(-1), axis=-1)                       # (..., Fh, K, Fw*K)
    x = x.reshape(x.shape[:-1] + (Fw, K))                             # (..., Fh, K, Fw, K)
    nd = x.ndim
    perm = tuple(range(nd - 4)) + (nd - 4, nd - 2, nd - 3, nd - 1)    # (..., Fh, Fw, K, K)
    return jnp.transpose(x, perm)


def _pick_c_tile(C, per_c_out_bytes, other_steps,
                 target_bytes=2 * 1024 * 1024, min_steps=8):
    """Largest divisor of C whose output block fits ~2 MiB and (if possible)
    still leaves >= min_steps grid steps for pipelining / megacore balance."""
    divisors = [d for d in range(1, C + 1) if C % d == 0]
    fitting = [d for d in divisors if d * per_c_out_bytes <= target_bytes] or [1]
    stepped = [d for d in fitting if other_steps * (C // d) >= min_steps]
    return max(stepped) if stepped else max(fitting)


def _vmem_limit_bytes():
    """Generation-aware VMEM cap: ~3/4 of per-core capacity (48 MiB on v7x,
    96 MiB on v5e/v6e); conservative 48 MiB if the query is unavailable."""
    cap = 64 * 1024 * 1024
    try:
        cap = pltpu.get_tpu_info().vmem_capacity_bytes
    except Exception:
        pass
    return max(32 * 1024 * 1024, min(int(cap * 3 // 4), 96 * 1024 * 1024))


# -----------------------------------------------------------------------------
# Pallas kernel: pose transform for one (sample n, out-capsule tile) block.
#
#   pos_ref : (1, B, P*P, L)    bf16  unfolded poses, row r = i*P + m,
#                                     lane l = (f1*F + f2)*K*K + k1*K + k2
#   w_ref   : (B, Ct, P*P, KK)  bf16  un-broadcast weights, row r = m*P + j
#   out_ref : (1, B, Ct, P*P, L)      V, row r = i*P + j (torch byte layout)
#
#   V[b,c, i*P+j, l] = sum_m pos[b, i*P+m, l] * w[b, c, m*P+j, l mod KK]
#
# The contraction length is only P (=4), so it runs as P VPU broadcast-
# multiply-adds on fully dense (16, L) tiles; the weight's F*F expansion is
# done in VMEM (lane concat of identical copies), never in HBM.
# TODO(synk): if profiling on v7x shows the VALU slot capping below the
# 3.2 TB/s HBM roofline, fall back to per-(k1,k2) MXU matmuls.
# -----------------------------------------------------------------------------
def _capsule_pose_kernel(pos_ref, w_ref, out_ref, *, P, FF):
    B, Ct = w_ref.shape[0], w_ref.shape[1]
    L = pos_ref.shape[-1]

    acc = None
    for m in range(P):                                   # static unroll, P = 4
        # ---- poses: rows (i, m) -> dense 16-row (i, j) tile (j broadcast) ---
        pieces = []
        for i in range(P):
            r = i * P + m
            row = pos_ref[0, :, r:r + 1, :].astype(jnp.float32)     # (B, 1, L)
            pieces.append(jnp.broadcast_to(row, (B, P, L)))         # sublane bcast
        pos16 = jnp.concatenate(pieces, axis=1)                     # (B, 16, L)

        # ---- weights: rows (m, j) -> dense 16 rows (i, j), tiled over F*F ---
        w_m = w_ref[:, :, m * P:(m + 1) * P, :].astype(jnp.float32)  # (B,Ct,P,KK)
        w_m = _tile_concat(w_m, P, axis=2)                           # (B,Ct,16,KK)
        w_m = _tile_concat(w_m, FF, axis=3)                          # (B,Ct,16,L)

        term = pos16[:, None] * w_m                                  # (B,Ct,16,L)
        acc = term if acc is None else acc + term

    out_ref[0] = acc.astype(out_ref.dtype)


# -----------------------------------------------------------------------------
# Wrapper
# -----------------------------------------------------------------------------
def conv_capsules2d_forward(activations, poses, W_ij, *, kernel_size, stride,
                            padding=0, c_tile=None,
                            compute_dtype=jnp.bfloat16,
                            out_dtype=jnp.float32):
    """Reproduces ConvCapsules2d.forward (padding/coor_add/share_W_ij defaults)."""
    K, S = kernel_size, stride

    if padding != 0:
        pad = [padding] * 4 if isinstance(padding, int) else list(padding)
        # torch F.pad pads the LAST dim with (pad[0], pad[1]) and the
        # second-to-last with (pad[2], pad[3]).
        activations = jnp.pad(
            activations, ((0, 0), (0, 0), (pad[2], pad[3]), (pad[0], pad[1])))
        poses = jnp.pad(
            poses, ((0, 0),) * 4 + ((pad[2], pad[3]), (pad[0], pad[1])))

    N, B, P, _, H, Wsp = poses.shape
    C = W_ij.shape[2]
    F_ = (Wsp - K) // S + 1
    KK = K * K
    FF = F_ * F_
    L = FF * KK                               # flattened (f1, f2, k1, k2) axis
    PP = P * P

    # -- activations output: pure data movement (no kernel needed) -------------
    acts_unf = _unfold2d(activations, K, S)                    # (N, B, F, F, K, K)
    acts_out = acts_unf.reshape(N, B, 1, 1, 1, F_, F_, K, K)

    # -- kernel inputs ----------------------------------------------------------
    # Unfolded poses in bf16, rows = (i, m), lanes = (f1, f2, k1, k2); both
    # trailing merges are free (contiguous) reshapes.
    # TODO(synk): fuse this strided-window gather into the kernel via manual
    # DMA only if pose traffic (~output/(2C)) ever matters for small C.
    pos_unf = _unfold2d(poses.astype(compute_dtype), K, S)      # (N,B,P,P,F,F,K,K)
    pos_arr = pos_unf.reshape(N, B, PP, L)

    # Weights stay UN-broadcast: (B, C, (m,j), (k1,k2)) -- a few KB in HBM.
    w_arr = W_ij.reshape(B, C, PP, KK).astype(compute_dtype)

    # -- tiling / VMEM budget ---------------------------------------------------
    per_c_out_bytes = B * PP * L * np.dtype(out_dtype).itemsize
    if c_tile is None:
        c_tile = _pick_c_tile(C, per_c_out_bytes, N)
    assert C % c_tile == 0
    grid = (N, C // c_tile)

    kernel = functools.partial(_capsule_pose_kernel, P=P, FF=FF)

    # NOTE: L = F*F*K*K is rarely a multiple of 128; padding it would force an
    # extra post-slice HBM pass over the largest tensor, so the tail vreg stays
    # masked instead (cheaper for all realistic F).
    out = pl.pallas_call(
        kernel,
        out_shape=jax.ShapeDtypeStruct((N, B, C, PP, L), out_dtype),
        grid_spec=pltpu.PrefetchScalarGridSpec(
            num_scalar_prefetch=0,
            grid=grid,
            in_specs=[
                # Poses for sample n: index depends only on the outer axis ->
                # stays VMEM-resident across the inner c steps (fetched once).
                pl.BlockSpec((1, B, PP, L), lambda n, c: (n, 0, 0, 0)),
                # Un-broadcast weights: tiny, cheap to (re)fetch per step.
                pl.BlockSpec((B, c_tile, PP, KK), lambda n, c: (0, c, 0, 0)),
            ],
            # Output block written directly in the final torch byte layout.
            out_specs=pl.BlockSpec((1, B, c_tile, PP, L),
                                   lambda n, c: (n, 0, c, 0, 0)),
        ),
        compiler_params=pltpu.CompilerParams(
            dimension_semantics=("parallel", "parallel"),
            vmem_limit_bytes=_vmem_limit_bytes()),
    )(pos_arr, w_arr)

    # Free reshape: (N, B, C, 16, L) is byte-identical to the PyTorch layout.
    V_ji = out.reshape(N, B, C, PP, 1, F_, F_, K, K)

    # TODO(synk): coor_add and share_W_ij branches not implemented (defaults are False).
    return acts_out, V_ji


# -----------------------------------------------------------------------------
# Pure-JAX reference (same bf16 input rounding; f32 accumulation)
# -----------------------------------------------------------------------------
def _reference_forward(activations, poses, W_ij, *, kernel_size, stride,
                       compute_dtype=jnp.bfloat16):
    K, S = kernel_size, stride
    N, B, P = poses.shape[0], poses.shape[1], poses.shape[2]
    C = W_ij.shape[2]
    F_ = (poses.shape[-1] - K) // S + 1
    poses_q = poses.astype(compute_dtype).astype(jnp.float32)
    W_q = W_ij.reshape(B, C, P, P, K, K).astype(compute_dtype).astype(jnp.float32)
    poses_unf = _unfold2d(poses_q, K, S)                       # (N,B,i,m,F,F,K,K)
    acts_unf = _unfold2d(activations, K, S)
    V = jnp.einsum('nbimxykl,bcmjkl->nbcijxykl', poses_unf, W_q,
                   precision=jax.lax.Precision.HIGHEST)
    V_ji = V.reshape(N, B, C, P * P, 1, F_, F_, K, K)
    acts_out = acts_unf.reshape(N, B, 1, 1, 1, F_, F_, K, K)
    return acts_out, V_ji


if __name__ == "__main__":
    # Small configuration consistent with ConvCapsules2d:
    #   in_caps B=4, out_caps C=4, pose_dim P=4, kernel K=3, stride S=2.
    N, B, C, P = 2, 4, 4, 4
    H = Wsp = 8
    K, S = 3, 2

    key = jax.random.PRNGKey(0)
    k_act, k_pose, k_w = jax.random.split(key, 3)

    activations = jax.random.normal(k_act, (N, B, H, Wsp), dtype=jnp.float32)
    poses = jax.random.normal(k_pose, (N, B, P, P, H, Wsp), dtype=jnp.float32)

    # xavier_uniform init, matching the module's __init__.
    PP = max(2, P * P)
    fan_in = B * K * K * PP
    fan_out = C * K * K * PP
    std = np.sqrt(2.0 / (fan_in + fan_out))
    bound = np.sqrt(3.0) * std
    W_ij = jax.random.uniform(
        k_w, (1, B, C, 1, P, P, 1, 1, K, K),
        minval=-bound, maxval=bound, dtype=jnp.float32)

    fwd = functools.partial(conv_capsules2d_forward, kernel_size=K, stride=S,
                            padding=0)
    acts_out, V_ji = jax.jit(fwd)(activations, poses, W_ij)
    jax.block_until_ready((acts_out, V_ji))

    # Correctness check against a pure-JAX reference using the same bf16
    # rounding of the inputs (kernel accumulates in f32).
    acts_ref, V_ref = _reference_forward(
        activations, poses, W_ij, kernel_size=K, stride=S)
    np.testing.assert_allclose(np.asarray(acts_out), np.asarray(acts_ref),
                               rtol=1e-5, atol=1e-5)
    np.testing.assert_allclose(np.asarray(V_ji), np.asarray(V_ref),
                               rtol=1e-5, atol=1e-5)

    F_ = (Wsp - K) // S + 1
    assert acts_out.shape == (N, B, 1, 1, 1, F_, F_, K, K)
    assert V_ji.shape == (N, B, C, P * P, 1, F_, F_, K, K)

    print("KERNEL_OK")
</pallas_src>

<mosaic_0001>
module attributes {stable_mosaic.version = 11 : i64} {
  func.func @_capsule_pose_kernel(%arg0: i32, %arg1: i32, %arg2: memref<1x4x16x81xbf16, #tpu.memory_space<vmem>>, %arg3: memref<4x1x16x9xbf16, #tpu.memory_space<vmem>>, %arg4: memref<1x4x1x16x81xf32, #tpu.memory_space<vmem>>) attributes {dimension_semantics = [#tpu.dimension_semantics<parallel>, #tpu.dimension_semantics<parallel>], iteration_bounds = array<i64: 2, 4>, scalar_prefetch = 0 : i64, scratch_operands = 0 : i64, tpu.core_type = #tpu.core_type<tc>, window_params = [{transform_indices = @transform_0, window_bounds = array<i64: 1, 4, 16, 81>}, {transform_indices = @transform_1, window_bounds = array<i64: 4, 1, 16, 9>}, {transform_indices = @transform_2, window_bounds = array<i64: 1, 4, 1, 16, 81>}]} {
    %c0 = arith.constant 0 : index
    %c0_0 = arith.constant 0 : index
    %c0_1 = arith.constant 0 : index
    %c0_2 = arith.constant 0 : index
    %0 = vector.load %arg2[%c0, %c0_0, %c0_1, %c0_2] : memref<1x4x16x81xbf16, #tpu.memory_space<vmem>>, vector<1x4x1x81xbf16>
    %1 = vector.shape_cast %0 : vector<1x4x1x81xbf16> to vector<4x1x81xbf16>
    %2 = arith.extf %1 : vector<4x1x81xbf16> to vector<4x1x81xf32>
    %3 = vector.shape_cast %2 : vector<4x1x81xf32> to vector<4x1x81xf32>
    %4 = vector.broadcast %3 : vector<4x1x81xf32> to vector<4x4x81xf32>
    %c0_3 = arith.constant 0 : index
    %c0_4 = arith.constant 0 : index
    %c4 = arith.constant 4 : index
    %c0_5 = arith.constant 0 : index
    %5 = vector.load %arg2[%c0_3, %c0_4, %c4, %c0_5] : memref<1x4x16x81xbf16, #tpu.memory_space<vmem>>, vector<1x4x1x81xbf16>
    %6 = vector.shape_cast %5 : vector<1x4x1x81xbf16> to vector<4x1x81xbf16>
    %7 = arith.extf %6 : vector<4x1x81xbf16> to vector<4x1x81xf32>
    %8 = vector.shape_cast %7 : vector<4x1x81xf32> to vector<4x1x81xf32>
    %9 = vector.broadcast %8 : vector<4x1x81xf32> to vector<4x4x81xf32>
    %c0_6 = arith.constant 0 : index
    %c0_7 = arith.constant 0 : index
    %c8 = arith.constant 8 : index
    %c0_8 = arith.constant 0 : index
    %10 = vector.load %arg2[%c0_6, %c0_7, %c8, %c0_8] : memref<1x4x16x81xbf16, #tpu.memory_space<vmem>>, vector<1x4x1x81xbf16>
    %11 = vector.shape_cast %10 : vector<1x4x1x81xbf16> to vector<4x1x81xbf16>
    %12 = arith.extf %11 : vector<4x1x81xbf16> to vector<4x1x81xf32>
    %13 = vector.shape_cast %12 : vector<4x1x81xf32> to vector<4x1x81xf32>
    %14 = vector.broadcast %13 : vector<4x1x81xf32> to vector<4x4x81xf32>
    %c0_9 = arith.constant 0 : index
    %c0_10 = arith.constant 0 : index
    %c12 = arith.constant 12 : index
    %c0_11 = arith.constant 0 : index
    %15 = vector.load %arg2[%c0_9, %c0_10, %c12, %c0_11] : memref<1x4x16x81xbf16, #tpu.memory_space<vmem>>, vector<1x4x1x81xbf16>
    %16 = vector.shape_cast %15 : vector<1x4x1x81xbf16> to vector<4x1x81xbf16>
    %17 = arith.extf %16 : vector<4x1x81xbf16> to vector<4x1x81xf32>
    %18 = vector.shape_cast %17 : vector<4x1x81xf32> to vector<4x1x81xf32>
    %19 = vector.broadcast %18 : vector<4x1x81xf32> to vector<4x4x81xf32>
    %20 = tpu.concatenate %4, %9, %14, %19 in 1 : vector<4x4x81xf32>, vector<4x4x81xf32>, vector<4x4x81xf32>, vector<4x4x81xf32> -> vector<4x16x81xf32>
    %c0_12 = arith.constant 0 : index
    %c0_13 = arith.constant 0 : index
    %c0_14 = arith.constant 0 : index
    %c0_15 = arith.constant 0 : index
    %21 = vector.load %arg3[%c0_12, %c0_13, %c0_14, %c0_15] : memref<4x1x16x9xbf16, #tpu.memory_space<vmem>>, vector<4x1x4x9xbf16>
    %22 = arith.extf %21 : vector<4x1x4x9xbf16> to vector<4x1x4x9xf32>
    %23 = tpu.concatenate %22, %22 in 2 : vector<4x1x4x9xf32>, vector<4x1x4x9xf32> -> vector<4x1x8x9xf32>
    %24 = tpu.concatenate %23, %23 in 2 : vector<4x1x8x9xf32>, vector<4x1x8x9xf32> -> vector<4x1x16x9xf32>
    %25 = tpu.concatenate %24, %24 in 3 : vector<4x1x16x9xf32>, vector<4x1x16x9xf32> -> vector<4x1x16x18xf32>
    %26 = tpu.concatenate %25, %25 in 3 : vector<4x1x16x18xf32>, vector<4x1x16x18xf32> -> vector<4x1x16x36xf32>
    %27 = tpu.concatenate %26, %26 in 3 : vector<4x1x16x36xf32>, vector<4x1x16x36xf32> -> vector<4x1x16x72xf32>
    %28 = tpu.concatenate %27, %24 in 3 : vector<4x1x16x72xf32>, vector<4x1x16x9xf32> -> vector<4x1x16x81xf32>
    %29 = vector.shape_cast %20 : vector<4x16x81xf32> to vector<4x1x16x81xf32>
    %30 = arith.mulf %29, %28 : vector<4x1x16x81xf32>
    %c0_16 = arith.constant 0 : index
    %c0_17 = arith.constant 0 : index
    %c1 = arith.constant 1 : index
    %c0_18 = arith.constant 0 : index
    %31 = vector.load %arg2[%c0_16, %c0_17, %c1, %c0_18] : memref<1x4x16x81xbf16, #tpu.memory_space<vmem>>, vector<1x4x1x81xbf16>
    %32 = vector.shape_cast %31 : vector<1x4x1x81xbf16> to vector<4x1x81xbf16>
    %33 = arith.extf %32 : vector<4x1x81xbf16> to vector<4x1x81xf32>
    %34 = vector.shape_cast %33 : vector<4x1x81xf32> to vector<4x1x81xf32>
    %35 = vector.broadcast %34 : vector<4x1x81xf32> to vector<4x4x81xf32>
    %c0_19 = arith.constant 0 : index
    %c0_20 = arith.constant 0 : index
    %c5 = arith.constant 5 : index
    %c0_21 = arith.constant 0 : index
    %36 = vector.load %arg2[%c0_19, %c0_20, %c5, %c0_21] : memref<1x4x16x81xbf16, #tpu.memory_space<vmem>>, vector<1x4x1x81xbf16>
    %37 = vector.shape_cast %36 : vector<1x4x1x81xbf16> to vector<4x1x81xbf16>
    %38 = arith.extf %37 : vector<4x1x81xbf16> to vector<4x1x81xf32>
    %39 = vector.shape_cast %38 : vector<4x1x81xf32> to vector<4x1x81xf32>
    %40 = vector.broadcast %39 : vector<4x1x81xf32> to vector<4x4x81xf32>
    %c0_22 = arith.constant 0 : index
    %c0_23 = arith.constant 0 : index
    %c9 = arith.constant 9 : index
    %c0_24 = arith.constant 0 : index
    %41 = vector.load %arg2[%c0_22, %c0_23, %c9, %c0_24] : memref<1x4x16x81xbf16, #tpu.memory_space<vmem>>, vector<1x4x1x81xbf16>
    %42 = vector.shape_cast %41 : vector<1x4x1x81xbf16> to vector<4x1x81xbf16>
    %43 = arith.extf %42 : vector<4x1x81xbf16> to vector<4x1x81xf32>
    %44 = vector.shape_cast %43 : vector<4x1x81xf32> to vector<4x1x81xf32>
    %45 = vector.broadcast %44 : vector<4x1x81xf32> to vector<4x4x81xf32>
    %c0_25 = arith.constant 0 : index
    %c0_26 = arith.constant 0 : index
    %c13 = arith.constant 13 : index
    %c0_27 = arith.constant 0 : index
    %46 = vector.load %arg2[%c0_25, %c0_26, %c13, %c0_27] : memref<1x4x16x81xbf16, #tpu.memory_space<vmem>>, vector<1x4x1x81xbf16>
    %47 = vector.shape_cast %46 : vector<1x4x1x81xbf16> to vector<4x1x81xbf16>
    %48 = arith.extf %47 : vector<4x1x81xbf16> to vector<4x1x81xf32>
    %49 = vector.shape_cast %48 : vector<4x1x81xf32> to vector<4x1x81xf32>
    %50 = vector.broadcast %49 : vector<4x1x81xf32> to vector<4x4x81xf32>
    %51 = tpu.concatenate %35, %40, %45, %50 in 1 : vector<4x4x81xf32>, vector<4x4x81xf32>, vector<4x4x81xf32>, vector<4x4x81xf32> -> vector<4x16x81xf32>
    %c0_28 = arith.constant 0 : index
    %c0_29 = arith.constant 0 : index
    %c4_30 = arith.constant 4 : index
    %c0_31 = arith.constant 0 : index
    %52 = vector.load %arg3[%c0_28, %c0_29, %c4_30, %c0_31] : memref<4x1x16x9xbf16, #tpu.memory_space<vmem>>, vector<4x1x4x9xbf16>
    %53 = arith.extf %52 : vector<4x1x4x9xbf16> to vector<4x1x4x9xf32>
    %54 = tpu.concatenate %53, %53 in 2 : vector<4x1x4x9xf32>, vector<4x1x4x9xf32> -> vector<4x1x8x9xf32>
    %55 = tpu.concatenate %54, %54 in 2 : vector<4x1x8x9xf32>, vector<4x1x8x9xf32> -> vector<4x1x16x9xf32>
    %56 = tpu.concatenate %55, %55 in 3 : vector<4x1x16x9xf32>, vector<4x1x16x9xf32> -> vector<4x1x16x18xf32>
    %57 = tpu.concatenate %56, %56 in 3 : vector<4x1x16x18xf32>, vector<4x1x16x18xf32> -> vector<4x1x16x36xf32>
    %58 = tpu.concatenate %57, %57 in 3 : vector<4x1x16x36xf32>, vector<4x1x16x36xf32> -> vector<4x1x16x72xf32>
    %59 = tpu.concatenate %58, %55 in 3 : vector<4x1x16x72xf32>, vector<4x1x16x9xf32> -> vector<4x1x16x81xf32>
    %60 = vector.shape_cast %51 : vector<4x16x81xf32> to vector<4x1x16x81xf32>
    %61 = arith.mulf %60, %59 : vector<4x1x16x81xf32>
    %62 = arith.addf %30, %61 : vector<4x1x16x81xf32>
    %c0_32 = arith.constant 0 : index
    %c0_33 = arith.constant 0 : index
    %c2 = arith.constant 2 : index
    %c0_34 = arith.constant 0 : index
    %63 = vector.load %arg2[%c0_32, %c0_33, %c2, %c0_34] : memref<1x4x16x81xbf16, #tpu.memory_space<vmem>>, vector<1x4x1x81xbf16>
    %64 = vector.shape_cast %63 : vector<1x4x1x81xbf16> to vector<4x1x81xbf16>
    %65 = arith.extf %64 : vector<4x1x81xbf16> to vector<4x1x81xf32>
    %66 = vector.shape_cast %65 : vector<4x1x81xf32> to vector<4x1x81xf32>
    %67 = vector.broadcast %66 : vector<4x1x81xf32> to vector<4x4x81xf32>
    %c0_35 = arith.constant 0 : index
    %c0_36 = arith.constant 0 : index
    %c6 = arith.constant 6 : index
    %c0_37 = arith.constant 0 : index
    %68 = vector.load %arg2[%c0_35, %c0_36, %c6, %c0_37] : memref<1x4x16x81xbf16, #tpu.memory_space<vmem>>, vector<1x4x1x81xbf16>
    %69 = vector.shape_cast %68 : vector<1x4x1x81xbf16> to vector<4x1x81xbf16>
    %70 = arith.extf %69 : vector<4x1x81xbf16> to vector<4x1x81xf32>
    %71 = vector.shape_cast %70 : vector<4x1x81xf32> to vector<4x1x81xf32>
    %72 = vector.broadcast %71 : vector<4x1x81xf32> to vector<4x4x81xf32>
    %c0_38 = arith.constant 0 : index
    %c0_39 = arith.constant 0 : index
    %c10 = arith.constant 10 : index
    %c0_40 = arith.constant 0 : index
    %73 = vector.load %arg2[%c0_38, %c0_39, %c10, %c0_40] : memref<1x4x16x81xbf16, #tpu.memory_space<vmem>>, vector<1x4x1x81xbf16>
    %74 = vector.shape_cast %73 : vector<1x4x1x81xbf16> to vector<4x1x81xbf16>
    %75 = arith.extf %74 : vector<4x1x81xbf16> to vector<4x1x81xf32>
    %76 = vector.shape_cast %75 : vector<4x1x81xf32> to vector<4x1x81xf32>
    %77 = vector.broadcast %76 : vector<4x1x81xf32> to vector<4x4x81xf32>
    %c0_41 = arith.constant 0 : index
    %c0_42 = arith.constant 0 : index
    %c14 = arith.constant 14 : index
    %c0_43 = arith.constant 0 : index
    %78 = vector.load %arg2[%c0_41, %c0_42, %c14, %c0_43] : memref<1x4x16x81xbf16, #tpu.memory_space<vmem>>, vector<1x4x1x81xbf16>
    %79 = vector.shape_cast %78 : vector<1x4x1x81xbf16> to vector<4x1x81xbf16>
    %80 = arith.extf %79 : vector<4x1x81xbf16> to vector<4x1x81xf32>
    %81 = vector.shape_cast %80 : vector<4x1x81xf32> to vector<4x1x81xf32>
    %82 = vector.broadcast %81 : vector<4x1x81xf32> to vector<4x4x81xf32>
    %83 = tpu.concatenate %67, %72, %77, %82 in 1 : vector<4x4x81xf32>, vector<4x4x81xf32>, vector<4x4x81xf32>, vector<4x4x81xf32> -> vector<4x16x81xf32>
    %c0_44 = arith.constant 0 : index
    %c0_45 = arith.constant 0 : index
    %c8_46 = arith.constant 8 : index
    %c0_47 = arith.constant 0 : index
    %84 = vector.load %arg3[%c0_44, %c0_45, %c8_46, %c0_47] : memref<4x1x16x9xbf16, #tpu.memory_space<vmem>>, vector<4x1x4x9xbf16>
    %85 = arith.extf %84 : vector<4x1x4x9xbf16> to vector<4x1x4x9xf32>
    %86 = tpu.concatenate %85, %85 in 2 : vector<4x1x4x9xf32>, vector<4x1x4x9xf32> -> vector<4x1x8x9xf32>
    %87 = tpu.concatenate %86, %86 in 2 : vector<4x1x8x9xf32>, vector<4x1x8x9xf32> -> vector<4x1x16x9xf32>
    %88 = tpu.concatenate %87, %87 in 3 : vector<4x1x16x9xf32>, vector<4x1x16x9xf32> -> vector<4x1x16x18xf32>
    %89 = tpu.concatenate %88, %88 in 3 : vector<4x1x16x18xf32>, vector<4x1x16x18xf32> -> vector<4x1x16x36xf32>
    %90 = tpu.concatenate %89, %89 in 3 : vector<4x1x16x36xf32>, vector<4x1x16x36xf32> -> vector<4x1x16x72xf32>
    %91 = tpu.concatenate %90, %87 in 3 : vector<4x1x16x72xf32>, vector<4x1x16x9xf32> -> vector<4x1x16x81xf32>
    %92 = vector.shape_cast %83 : vector<4x16x81xf32> to vector<4x1x16x81xf32>
    %93 = arith.mulf %92, %91 : vector<4x1x16x81xf32>
    %94 = arith.addf %62, %93 : vector<4x1x16x81xf32>
    %c0_48 = arith.constant 0 : index
    %c0_49 = arith.constant 0 : index
    %c3 = arith.constant 3 : index
    %c0_50 = arith.constant 0 : index
    %95 = vector.load %arg2[%c0_48, %c0_49, %c3, %c0_50] : memref<1x4x16x81xbf16, #tpu.memory_space<vmem>>, vector<1x4x1x81xbf16>
    %96 = vector.shape_cast %95 : vector<1x4x1x81xbf16> to vector<4x1x81xbf16>
    %97 = arith.extf %96 : vector<4x1x81xbf16> to vector<4x1x81xf32>
    %98 = vector.shape_cast %97 : vector<4x1x81xf32> to vector<4x1x81xf32>
    %99 = vector.broadcast %98 : vector<4x1x81xf32> to vector<4x4x81xf32>
    %c0_51 = arith.constant 0 : index
    %c0_52 = arith.constant 0 : index
    %c7 = arith.constant 7 : index
    %c0_53 = arith.constant 0 : index
    %100 = vector.load %arg2[%c0_51, %c0_52, %c7, %c0_53] : memref<1x4x16x81xbf16, #tpu.memory_space<vmem>>, vector<1x4x1x81xbf16>
    %101 = vector.shape_cast %100 : vector<1x4x1x81xbf16> to vector<4x1x81xbf16>
    %102 = arith.extf %101 : vector<4x1x81xbf16> to vector<4x1x81xf32>
    %103 = vector.shape_cast %102 : vector<4x1x81xf32> to vector<4x1x81xf32>
    %104 = vector.broadcast %103 : vector<4x1x81xf32> to vector<4x4x81xf32>
    %c0_54 = arith.constant 0 : index
    %c0_55 = arith.constant 0 : index
    %c11 = arith.constant 11 : index
    %c0_56 = arith.constant 0 : index
    %105 = vector.load %arg2[%c0_54, %c0_55, %c11, %c0_56] : memref<1x4x16x81xbf16, #tpu.memory_space<vmem>>, vector<1x4x1x81xbf16>
    %106 = vector.shape_cast %105 : vector<1x4x1x81xbf16> to vector<4x1x81xbf16>
    %107 = arith.extf %106 : vector<4x1x81xbf16> to vector<4x1x81xf32>
    %108 = vector.shape_cast %107 : vector<4x1x81xf32> to vector<4x1x81xf32>
    %109 = vector.broadcast %108 : vector<4x1x81xf32> to vector<4x4x81xf32>
    %c0_57 = arith.constant 0 : index
    %c0_58 = arith.constant 0 : index
    %c15 = arith.constant 15 : index
    %c0_59 = arith.constant 0 : index
    %110 = vector.load %arg2[%c0_57, %c0_58, %c15, %c0_59] : memref<1x4x16x81xbf16, #tpu.memory_space<vmem>>, vector<1x4x1x81xbf16>
    %111 = vector.shape_cast %110 : vector<1x4x1x81xbf16> to vector<4x1x81xbf16>
    %112 = arith.extf %111 : vector<4x1x81xbf16> to vector<4x1x81xf32>
    %113 = vector.shape_cast %112 : vector<4x1x81xf32> to vector<4x1x81xf32>
    %114 = vector.broadcast %113 : vector<4x1x81xf32> to vector<4x4x81xf32>
    %115 = tpu.concatenate %99, %104, %109, %114 in 1 : vector<4x4x81xf32>, vector<4x4x81xf32>, vector<4x4x81xf32>, vector<4x4x81xf32> -> vector<4x16x81xf32>
    %c0_60 = arith.constant 0 : index
    %c0_61 = arith.constant 0 : index
    %c12_62 = arith.constant 12 : index
    %c0_63 = arith.constant 0 : index
    %116 = vector.load %arg3[%c0_60, %c0_61, %c12_62, %c0_63] : memref<4x1x16x9xbf16, #tpu.memory_space<vmem>>, vector<4x1x4x9xbf16>
    %117 = arith.extf %116 : vector<4x1x4x9xbf16> to vector<4x1x4x9xf32>
    %118 = tpu.concatenate %117, %117 in 2 : vector<4x1x4x9xf32>, vector<4x1x4x9xf32> -> vector<4x1x8x9xf32>
    %119 = tpu.concatenate %118, %118 in 2 : vector<4x1x8x9xf32>, vector<4x1x8x9xf32> -> vector<4x1x16x9xf32>
    %120 = tpu.concatenate %119, %119 in 3 : vector<4x1x16x9xf32>, vector<4x1x16x9xf32> -> vector<4x1x16x18xf32>
    %121 = tpu.concatenate %120, %120 in 3 : vector<4x1x16x18xf32>, vector<4x1x16x18xf32> -> vector<4x1x16x36xf32>
    %122 = tpu.concatenate %121, %121 in 3 : vector<4x1x16x36xf32>, vector<4x1x16x36xf32> -> vector<4x1x16x72xf32>
    %123 = tpu.concatenate %122, %119 in 3 : vector<4x1x16x72xf32>, vector<4x1x16x9xf32> -> vector<4x1x16x81xf32>
    %124 = vector.shape_cast %115 : vector<4x16x81xf32> to vector<4x1x16x81xf32>
    %125 = arith.mulf %124, %123 : vector<4x1x16x81xf32>
    %126 = arith.addf %94, %125 : vector<4x1x16x81xf32>
    %c0_64 = arith.constant 0 : index
    %c0_65 = arith.constant 0 : index
    %c0_66 = arith.constant 0 : index
    %c0_67 = arith.constant 0 : index
    %c0_68 = arith.constant 0 : index
    %127 = vector.load %arg4[%c0_64, %c0_65, %c0_66, %c0_67, %c0_68] : memref<1x4x1x16x81xf32, #tpu.memory_space<vmem>>, vector<1x4x1x16x81xf32>
    %128 = vector.shape_cast %127 : vector<1x4x1x16x81xf32> to vector<4x1x16x81xf32>
    %129 = vector.shape_cast %126 : vector<4x1x16x81xf32> to vector<1x4x1x16x81xf32>
    tpu.vector_store %arg4[%c0_64, %c0_65, %c0_66, %c0_67, %c0_68], %129 {strides = array<i32>} : memref<1x4x1x16x81xf32, #tpu.memory_space<vmem>>, vector<1x4x1x16x81xf32>,
    return
  }
  func.func @transform_0(%arg0: i32, %arg1: i32) -> (i32, i32, i32, i32) {
    %c0_i32 = arith.constant 0 : i32
    %c0_i32_0 = arith.constant 0 : i32
    %c0_i32_1 = arith.constant 0 : i32
    %c0_i32_2 = arith.constant 0 : i32
    return %arg0, %c0_i32, %c0_i32_0, %c0_i32_1 : i32, i32, i32, i32
  }
  func.func @transform_1(%arg0: i32, %arg1: i32) -> (i32, i32, i32, i32) {
    %c0_i32 = arith.constant 0 : i32
    %c0_i32_0 = arith.constant 0 : i32
    %c0_i32_1 = arith.constant 0 : i32
    %c0_i32_2 = arith.constant 0 : i32
    return %c0_i32, %arg1, %c0_i32_0, %c0_i32_1 : i32, i32, i32, i32
  }
  func.func @transform_2(%arg0: i32, %arg1: i32) -> (i32, i32, i32, i32, i32) {
    %c0_i32 = arith.constant 0 : i32
    %c0_i32_0 = arith.constant 0 : i32
    %c0_i32_1 = arith.constant 0 : i32
    %c0_i32_2 = arith.constant 0 : i32
    return %arg0, %c0_i32, %arg1, %c0_i32_0, %c0_i32_1 : i32, i32, i32, i32, i32
  }
}

</mosaic_0001>

<bundles_post_ra>
// kernel: conv_capsules2d_forward.1
= control target key start
LH: loop header
LB: loop body
LE: loop exit
PB: predicated region body
PF: predicated region fallthrough
CT: control target
= control target key end

     0   :  { %s1569_s9 = smov 0   ;;  %s1571_s10 = smov 0   ;;  %s2300_s0 = inlined_call_operand.vmem [shape: bf16[2,4,16,81], index: 0, kind: input, shape index: {}]   ;;  %s2301_s1 = inlined_call_operand.vmem [shape: bf16[4,4,16,9], index: 1, kind: input, shape index: {}]   ;;  %s2302_s2 = inlined_call_operand.vmem [shape: f32[2,4,4,16,81], index: 2, kind: output, shape index: {}]  }
   0x1   :  { %s1573_s11 = smov 0   ;;  %s1575_s12 = smov 0  }
   0x2   :  { %s1577_s13 = smov 0   ;;  %s1579_s14 = smov 0  }
   0x3   :  { %s1581_s15 = smov 0   ;;  %s1583_s16 = smov 0  }
   0x4   :  { %s1585_s17 = smov 0  }
   0x5 LB: > { %s1222_s18 = sadd.s32 4294967295, %s1548_s17   ;;  %s21_s19 = sadd.s32 1, %s1540_s15  ;;  %s1548_s17 = sphi %s1585_s17, %s12_s17   ;;  %s1544_s16 = sphi %s1583_s16, %s2384_s16   ;;  %s1540_s15 = sphi %s1581_s15, %s2383_s15   ;;  %s1536_s14 = sphi %s1579_s14, %s2382_s14   ;;  %s1532_s13 = sphi %s1577_s13, %s2381_s13   ;;  %s1528_s12 = sphi %s1575_s12, %s2380_s12   ;;  %s1524_s11 = sphi %s1573_s11, %s2379_s11   ;;  %s1520_s10 = sphi %s1571_s10, %s2378_s10   ;;  %s1516_s9 = sphi %s1569_s9, %s2377_s9  }
   0x6   : > { %p22_p0 = scmp.ge.s32.totalorder %s21_s19, 4  ;;  %s24_s20 = sadd.s32 1, %s1544_s16 }
   0x7   : > { %s57_s21 = sadd.s32 1, %s1528_s12  ;;  %p64_p1 = scmp.ne.s32.totalorder %s1528_s12, %s1524_s11 }
   0x8   : > { %s2386_s19 = smov (%p22_p0, %s21_s19), 0  ;;  %s2388_s20 = smov (!%p22_p0, %s24_s20), %s1544_s16 }
   0x9   : > { %s54_s22 = ssub.s32 %s1540_s15, %s2386_s19  ;;  %p65_p2 = scmp.eq.s32.totalorder %s1548_s17, 0 }
   0xa   : > { %p26_p3 = scmp.ge.s32.totalorder %s2388_s20, 2  ;;  %p55_p4 = scmp.eq.s32.totalorder %s54_s22, 0 }
   0xb   : > { %p66_p5 = por %p65_p2, %p64_p1  ;;  %s85_s23 = sadd.s32 1, %s1520_s10 }
   0xc   : > { %s2390_s20 = smov (%p26_p3, %s2388_s20), 0  ;;  %p95_p6 = scmp.ne.s32.totalorder %s1520_s10, %s1516_s9 }
   0xd   : > { %s1630_s24 = scalar_select %p55_p4, %s1528_s12, %s57_s21  }
   0xe   : > { %s80_s25 = ssub.s32 %s1544_s16, %s2390_s20  ;;  %p96_p7 = scmp.eq.s32.totalorder %s1222_s18, 7 }
   0xf   : > { %s82_s26 = sor.u32 %s80_s25, %s54_s22  ;;  %p1225_p10 = scmp.ge.s32.totalorder %s1548_s17, 8 }
  0x10   : > { %p83_p8 = scmp.eq.s32.totalorder %s82_s26, 0  ;;  %p1636_p9 = por %p96_p7, %p95_p6 }
  0x11   : > { %118 = sbr.rel (%p1225_p10) target bundleno = 30 (0x1e), region = 16 }
  0x12   : > { %s1641_s28 = scalar_select %p83_p8, %s1520_s10, %s85_s23  }
  0x16   : > { %129 = sbr.rel (!%p66_p5) target bundleno = 30 (0x1e), region = 24  ;;  %s131_s29 = sand.u32 (%p66_p5), 1, %s1528_s12  }
  0x17   : > { %s1240_s30 = sshll.u32 (%p66_p5), %s1540_s15, 3  ;;  %s1226_s3 = sshll.u32 (%p66_p5), %s131_s29, 5 }
  0x18   : > { %s136_s6 = scalar_lea.vmem (%p66_p5), %s2301_s1, %s1240_s30  ;;  %s133_s7 = scalar_lea.vmem (%p66_p5), [#allocation2], %s1226_s3 }
  0x19   : > { %v153_v0 = vld [vmem:[%s136_s6] sm:$0xff] (%p66_p5)  }
  0x1a   : > { %v157_v1 = vld [vmem:[%s136_s6 + $0x20] sm:$0xff] (%p66_p5)   ;;  %154 = vst [vmem:[%s133_s7] sm:$0xff] (%p66_p5), %v153_v0  }
  0x1b   : > { %v161_v2 = vld [vmem:[%s136_s6 + $0x40] sm:$0xff]   ;;  %158 = vst [vmem:[%s133_s7 + $0x8] sm:$0xff] %v157_v1  }
  0x1c   : > { %162 = vst [vmem:[%s133_s7 + $0x10] sm:$0xff] %v161_v2   ;;  %v165_v3 = vld [vmem:[%s136_s6 + $0x60] sm:$0xff]  }
  0x1d   : > { %166 = vst [vmem:[%s133_s7 + $0x18] sm:$0xff] %v165_v3  }
  0x1e PF: > { %p1229_p11 = scmp.ge.s32.totalorder %s1548_s17, 1  ;;  %p207_p12 = scmp.lt.s32.totalorder %s1548_s17, 9 }
  0x20   : > { %p208_p13 = pnand %p1229_p11, %p207_p12 }
  0x22   : > { %211 = sbr.rel (%p208_p13) target bundleno = 449 (0x1c1), region = 65 }
  0x27   : > { %s214_s8 = sand.u32 1, %s1524_s11   ;;  %vm340_vm0 = vcmask 1043456   ;;  %s1550_s11 = smov 9   ;;  %vm389_vm1 = vcmask 72704   ;;  %vm410_vm2 = vcmask 146432   ;;  %vm431_vm3 = vcmask 293888  }
  0x28   : > { %s1230_s18 = sshll.u32 %s214_s8, 5  ;;  %s1551_s22 = smov 18   ;;  %vm448_vm4 = vcmask 588800   ;;  %vm1057_vm5 = vcmask 662528  }
  0x29   : > { %s1652_s21 = scalar_lea.vmem [#allocation2], %s1230_s18  ;;  %s1552_s23 = smov 72  }
  0x2a   : > { %v349_v4 = vld [vmem:[%s1652_s21] sm:$0x3]  ;;  %v350_v5 = vld [vmem:[%s1652_s21 + $0x8] sm:$0x3]  ;;  %v533_v6 = vld [vmem:[%s1652_s21] sm:$0xc] }
  0x2b   : > { %v353_v7 = vunpack.c.l.bf16 %v349_v4  ;;  %v354_v8 = vunpack.c.l.bf16 %v350_v5  ;;  %v534_v9 = vld [vmem:[%s1652_s21 + $0x8] sm:$0xc]  ;;  %v537_v10 = vunpack.c.l.bf16 %v533_v6  ;;  %v351_v11 = vld [vmem:[%s1652_s21 + $0x10] sm:$0x3]  ;;  %v352_v12 = vld [vmem:[%s1652_s21 + $0x18] sm:$0x3] }
  0x2c   : > { %v538_v13 = vunpack.c.l.bf16 %v534_v9  ;;  %v355_v14 = vunpack.c.l.bf16 %v351_v11  ;;  %v356_v15 = vunpack.c.l.bf16 %v352_v12  ;;  %v535_v16 = vld [vmem:[%s1652_s21 + $0x10] sm:$0xc]  ;;  %v536_v17 = vld [vmem:[%s1652_s21 + $0x18] sm:$0xc]  ;;  %v753_v22 = vld [vmem:[%s1652_s21 + $0x4] sm:$0x3] }
  0x2d   : > { %v361_v18 = vrot.slane %v353_v7, 4  ;;  %v362_v19 = vrot.slane %v354_v8, 4  ;;  %v545_v20 = vrot.slane %v537_v10, 4  ;;  %v539_v21 = vunpack.c.l.bf16 %v535_v16  ;;  %v754_v27 = vld [vmem:[%s1652_s21 + $0xc] sm:$0x3]  ;;  %s1553_s25 = smov 36  }
  0x2e   : > { %v546_v23 = vrot.slane %v538_v13, 4  ;;  %v363_v24 = vrot.slane %v355_v14, 4  ;;  %v364_v25 = vrot.slane %v356_v15, 4  ;;  %v540_v26 = vunpack.c.l.bf16 %v536_v17  ;;  %v755_v32 = vld [vmem:[%s1652_s21 + $0x14] sm:$0x3]  ;;  %p239_p0 = scmp.lt.s32.totalorder %s1536_s14, 1 }
  0x2f   : > { %v1665_v28 = vsel %vm340_vm0, %v353_v7, %v361_v18  ;;  %v1668_v29 = vsel %vm340_vm0, %v354_v8, %v362_v19  ;;  %v1671_v30 = vsel %vm340_vm0, %v545_v20, %v537_v10  ;;  %v547_v31 = vrot.slane %v539_v21, 4  ;;  %v756_v33 = vld [vmem:[%s1652_s21 + $0x1c] sm:$0x3]  ;;  %v941_v38 = vld [vmem:[%s1652_s21 + $0x4] sm:$0xc]  ;;  %s236_s5 = sand.u32 1, %s1516_s9  }
  0x30   : > { %v1677_v34 = vpack.i.bf16 %v1668_v29, %v1665_v28  ;;  %v1680_v35 = vsel %vm340_vm0, %v546_v23, %v538_v13  ;;  %v1683_v36 = vsel %vm340_vm0, %v355_v14, %v363_v24  ;;  %v1686_v37 = vsel %vm340_vm0, %v356_v15, %v364_v25  ;;  %v942_v39 = vld [vmem:[%s1652_s21 + $0xc] sm:$0xc]  ;;  %v943_v40 = vld [vmem:[%s1652_s21 + $0x14] sm:$0xc]  ;;  %v944_v49 = vld [vmem:[%s1652_s21 + $0x1c] sm:$0xc] }
  0x31   : > { %v1693_v41 = vpack.i.bf16 %v1680_v35, %v1671_v30  ;;  %v1697_v42 = vpack.i.bf16 %v1686_v37, %v1683_v36  ;;  %v548_v43 = vrot.slane %v540_v26, 4  ;;  %v1700_v44 = vsel %vm340_vm0, %v547_v31, %v539_v21  ;;  %s240_s26 = scalar_select %p239_p0, %s1536_s14, 1 }
  0x32   : > { %1319 = vrot.lane.b32.xlu0 %v1677_v34, %s1550_s11  ;;  %v757_v45 = vunpack.c.l.bf16 %v753_v22  ;;  %v758_v46 = vunpack.c.l.bf16 %v754_v27  ;;  %v759_v47 = vunpack.c.l.bf16 %v755_v32  ;;  %v760_v48 = vunpack.c.l.bf16 %v756_v33  ;;  %s1231_s9 = sshll.u32 %s236_s5, 6  ;;  %s1235_s7 = sshll.u32 (%p1636_p9), %s1532_s13, 1 }
  0x33   : > { %1329 = vrot.lane.b32.xlu1 %v1693_v41, %s1550_s11  ;;  %v556_v50 = vsel %vm340_vm0, %v548_v43, %v540_v26  ;;  %v945_v51 = vunpack.c.l.bf16 %v941_v38  ;;  %v946_v52 = vunpack.c.l.bf16 %v942_v39  ;;  %v947_v53 = vunpack.c.l.bf16 %v943_v40  ;;  %s1241_s29 = sshll.u32 %s240_s26, 5  ;;  %s238_s6 = scalar_lea.vmem [#allocation3], %s1231_s9 }
  0x34   : > { %v1709_v54 = vpack.i.bf16 %v556_v50, %v1700_v44  ;;  %v765_v55 = vrot.slane %v757_v45, 4  ;;  %v766_v56 = vrot.slane %v758_v46, 4  ;;  %v767_v57 = vrot.slane %v759_v47, 4  ;;  %s1903_s4 = scalar_lea.vmem %s2300_s0, %s1241_s29  ;;  %s1236_s8 = sshll.u32 (%p1636_p9), %s1536_s14, 5 }
  0x35   : > { %v768_v58 = vrot.slane %v760_v48, 4  ;;  %v953_v59 = vrot.slane %v945_v51, 4  ;;  %v954_v60 = vrot.slane %v946_v52, 4  ;;  %v948_v61 = vunpack.c.l.bf16 %v944_v49  ;;  %s1075_s18 = sadd.s32 (%p1636_p9), %s1236_s8, %s1235_s7 }
  0x36   : > { %1324 = vrot.lane.b32.xlu0 %v1697_v42, %s1550_s11  ;;  %v773_v62 = vsel %vm340_vm0, %v757_v45, %v765_v55  ;;  %v774_v63 = vsel %vm340_vm0, %v758_v46, %v766_v56  ;;  %v775_v0 = vsel %vm340_vm0, %v759_v47, %v767_v57  ;;  %v955_v1 = vrot.slane %v947_v53, 4  ;;  %s1237_s21 = sshll.u32 (%p1636_p9), %s1075_s18, 3 }
  0x37   : > { %1334 = vrot.lane.b32.xlu1 %v1709_v54, %s1550_s11  ;;  %v1718_v2 = vpack.i.bf16 %v774_v63, %v773_v62  ;;  %v776_v3 = vsel %vm340_vm0, %v760_v48, %v768_v58  ;;  %v961_v4 = vsel %vm340_vm0, %v953_v59, %v945_v51  ;;  %v962_v5 = vsel %vm340_vm0, %v954_v60, %v946_v52 }
  0x38   : > { %v1723_v6 = vpack.i.bf16 %v776_v3, %v775_v0  ;;  %v956_v7 = vrot.slane %v948_v61, 4  ;;  %v963_v8 = vsel %vm340_vm0, %v955_v1, %v947_v53  ;;  %v1728_v9 = vpack.i.bf16 %v962_v5, %v961_v4 }
  0x3a   : > { %1339 = vrot.lane.b32.xlu0 %v1718_v2, %s1550_s11  ;;  %v964_v10 = vsel %vm340_vm0, %v956_v7, %v948_v61 }
  0x3b   : > { %1344 = vrot.lane.b32.xlu1 %v1723_v6, %s1550_s11  ;;  %v1733_v11 = vpack.i.bf16 %v964_v10, %v963_v8 }
  0x3e   : > { %1349 = vrot.lane.b32.xlu0 %v1728_v9, %s1550_s11 }
  0x3f   : > { %1354 = vrot.lane.b32.xlu1 %v1733_v11, %s1550_s11 }
  0xa4   : > { %v1320_v12 = vpop.permute.xlu0 %1319 }
  0xa5   : > { %v1322_v13 = vunpack.i.h.bf16 %v1320_v12  ;;  %v1321_v14 = vunpack.i.l.bf16 %v1320_v12  ;;  %v1330_v15 = vpop.permute.xlu1 %1329 }
  0xa6   : > { %v1332_v16 = vunpack.i.h.bf16 %v1330_v15  ;;  %v1331_v17 = vunpack.i.l.bf16 %v1330_v15 }
  0xa7   : > { %v1741_v18 = vsel %vm389_vm1, %v1665_v28, %v1321_v14  ;;  %v1745_v19 = vsel %vm389_vm1, %v1668_v29, %v1322_v13 }
  0xa8   : > { %v1325_v20 = vpop.permute.xlu0 %1324  ;;  %v1358_v21 = vpack.i.bf16 %v1745_v19, %v1741_v18  ;;  %v1751_v22 = vsel %vm389_vm1, %v1671_v30, %v1331_v17  ;;  %v1755_v23 = vsel %vm389_vm1, %v1680_v35, %v1332_v16 }
  0xa9   : > { %v1327_v24 = vunpack.i.h.bf16 %v1325_v20  ;;  %v1326_v25 = vunpack.i.l.bf16 %v1325_v20  ;;  %v1335_v26 = vpop.permute.xlu1 %1334  ;;  %v1368_v29 = vpack.i.bf16 %v1755_v23, %v1751_v22 }
  0xaa   : > { %1359 = vrot.lane.b32.xlu0 %v1358_v21, %s1551_s22  ;;  %v1337_v27 = vunpack.i.h.bf16 %v1335_v26  ;;  %v1336_v28 = vunpack.i.l.bf16 %v1335_v26 }
  0xab   : > { %v392_v31 = vsel %vm389_vm1, %v1683_v36, %v1326_v25  ;;  %v393_v30 = vsel %vm389_vm1, %v1686_v37, %v1327_v24 }
  0xac   : > { %v1340_v32 = vpop.permute.xlu0 %1339  ;;  %v1363_v33 = vpack.i.bf16 %v393_v30, %v392_v31  ;;  %v1766_v35 = vsel %vm389_vm1, %v1700_v44, %v1336_v28  ;;  %v1769_v38 = vsel %vm389_vm1, %v556_v50, %v1337_v27 }
  0xad   : > { %v1342_v39 = vunpack.i.h.bf16 %v1340_v32  ;;  %v1341_v40 = vunpack.i.l.bf16 %v1340_v32  ;;  %v1345_v43 = vpop.permute.xlu1 %1344  ;;  %v1373_v37 = vpack.i.bf16 %v1769_v38, %v1766_v35 }
  0xae   : > { %1364 = vrot.lane.b32.xlu1 %v1363_v33, %s1551_s22  ;;  %1369 = vrot.lane.b32.xlu0 %v1368_v29, %s1551_s22  ;;  %v1347_v36 = vunpack.i.h.bf16 %v1345_v43  ;;  %v1346_v45 = vunpack.i.l.bf16 %v1345_v43 }
  0xaf   : > { %v793_v46 = vsel %vm389_vm1, %v773_v62, %v1341_v40  ;;  %v794_v44 = vsel %vm389_vm1, %v774_v63, %v1342_v39 }
  0xb0   : > { %v1350_v47 = vpop.permute.xlu0 %1349  ;;  %v1378_v48 = vpack.i.bf16 %v794_v44, %v793_v46  ;;  %v1778_v49 = vsel %vm389_vm1, %v775_v0, %v1346_v45  ;;  %v1781_v50 = vsel %vm389_vm1, %v776_v3, %v1347_v36 }
  0xb1   : > { %v1352_v51 = vunpack.i.h.bf16 %v1350_v47  ;;  %v1351_v52 = vunpack.i.l.bf16 %v1350_v47  ;;  %v1355_v53 = vpop.permute.xlu1 %1354  ;;  %v1383_v57 = vpack.i.bf16 %v1781_v50, %v1778_v49 }
  0xb2   : > { %1374 = vrot.lane.b32.xlu1 %v1373_v37, %s1551_s22  ;;  %1379 = vrot.lane.b32.xlu0 %v1378_v48, %s1551_s22  ;;  %v1357_v55 = vunpack.i.h.bf16 %v1355_v53  ;;  %v1356_v56 = vunpack.i.l.bf16 %v1355_v53 }
  0xb3   : > { %v981_v58 = vsel %vm389_vm1, %v961_v4, %v1351_v52  ;;  %v982_v59 = vsel %vm389_vm1, %v962_v5, %v1352_v51  ;;  %v268_v51 = vld [vmem:[%s1903_s4] sm:$0x4]  ;;  %v269_v52 = vld [vmem:[%s1903_s4 + $0x8] sm:$0x4] }
  0xb4   : > { %v1388_v60 = vpack.i.bf16 %v982_v59, %v981_v58  ;;  %v1790_v61 = vsel %vm389_vm1, %v963_v8, %v1356_v56  ;;  %v1793_v62 = vsel %vm389_vm1, %v964_v10, %v1357_v55  ;;  %v292_v56 = vld [vmem:[%s1903_s4 + $0x4] sm:$0x1] }
  0xb5   : > { %v1393_v63 = vpack.i.bf16 %v1793_v62, %v1790_v61 }
  0xb6   : > { %1384 = vrot.lane.b32.xlu1 %v1383_v57, %s1551_s22  ;;  %1389 = vrot.lane.b32.xlu0 %v1388_v60, %s1551_s22  ;;  %v293_v60 = vld [vmem:[%s1903_s4 + $0xc] sm:$0x1] }
  0xba   : > { %1394 = vrot.lane.b32.xlu1 %v1393_v63, %s1551_s22  ;;  %1399 = vrot.lane.b32.xlu0 %v1677_v34, %s1552_s23  ;;  %v273_v63 = vunpack.c.l.bf16 %v269_v52 }
  0xbe   : > { %1404 = vrot.lane.b32.xlu1 %v1697_v42, %s1552_s23  ;;  %1409 = vrot.lane.b32.xlu0 %v1693_v41, %s1552_s23 }
  0xc2   : > { %1414 = vrot.lane.b32.xlu1 %v1709_v54, %s1552_s23  ;;  %1419 = vrot.lane.b32.xlu0 %v1718_v2, %s1552_s23 }
  0xc6   : > { %1424 = vrot.lane.b32.xlu1 %v1723_v6, %s1552_s23 }
 0x11c   : > { %v1360_v0 = vpop.permute.xlu0 %1359 }
 0x11d   : > { %v1362_v1 = vunpack.i.h.bf16 %v1360_v0  ;;  %v1361_v3 = vunpack.i.l.bf16 %v1360_v0  ;;  %v246_v0 = vld [vmem:[%s1903_s4 + $0x10] sm:$0x1] }
 0x11f   : > { %v1814_v34 = vsel %vm410_vm2, %v1741_v18, %v1361_v3  ;;  %v1818_v41 = vsel %vm410_vm2, %v1745_v19, %v1362_v1  ;;  %v247_v1 = vld [vmem:[%s1903_s4 + $0x18] sm:$0x1]  ;;  %v270_v3 = vld [vmem:[%s1903_s4 + $0x10] sm:$0x4] }
 0x120   : > { %v1365_v42 = vpop.permute.xlu1 %1364  ;;  %v1370_v54 = vpop.permute.xlu0 %1369  ;;  %v1428_v2 = vpack.i.bf16 %v1818_v41, %v1814_v34 }
 0x121   : > { %v1367_v4 = vunpack.i.h.bf16 %v1365_v42  ;;  %v1366_v5 = vunpack.i.l.bf16 %v1365_v42  ;;  %v1372_v6 = vunpack.i.h.bf16 %v1370_v54  ;;  %v1371_v7 = vunpack.i.l.bf16 %v1370_v54  ;;  %v271_v42 = vld [vmem:[%s1903_s4 + $0x18] sm:$0x4]  ;;  %v294_v54 = vld [vmem:[%s1903_s4 + $0x14] sm:$0x1] }
 0x122   : > { %1429 = vrot.lane.b32.xlu0 %v1428_v2, %s1553_s25  ;;  %v296_v2 = vunpack.c.l.bf16 %v292_v56 }
 0x123   : > { %v1824_v8 = vsel %vm410_vm2, %v392_v31, %v1366_v5  ;;  %v1827_v10 = vsel %vm410_vm2, %v393_v30, %v1367_v4  ;;  %v1831_v12 = vsel %vm410_vm2, %v1751_v22, %v1371_v7  ;;  %v1835_v13 = vsel %vm410_vm2, %v1755_v23, %v1372_v6  ;;  %v1923_v7 = vld [vmem:[%s1903_s4 + $0x1c] sm:$0x1] }
 0x124   : > { %v1375_v14 = vpop.permute.xlu1 %1374  ;;  %v1380_v15 = vpop.permute.xlu0 %1379  ;;  %v1433_v16 = vpack.i.bf16 %v1827_v10, %v1824_v8  ;;  %v1438_v17 = vpack.i.bf16 %v1835_v13, %v1831_v12  ;;  %v297_v4 = vunpack.c.l.bf16 %v293_v60 }
 0x125   : > { %v1377_v18 = vunpack.i.h.bf16 %v1375_v14  ;;  %v1376_v19 = vunpack.i.l.bf16 %v1375_v14  ;;  %v1382_v20 = vunpack.i.h.bf16 %v1380_v15  ;;  %v1381_v21 = vunpack.i.l.bf16 %v1380_v15  ;;  %v318_v14 = vld [vmem:[%s1903_s4 + $0x14] sm:$0x4]  ;;  %v1927_v15 = vld [vmem:[%s1903_s4 + $0x1c] sm:$0x4] }
 0x126   : > { %1434 = vrot.lane.b32.xlu1 %v1433_v16, %s1553_s25  ;;  %1439 = vrot.lane.b32.xlu0 %v1438_v17, %s1553_s25 }
 0x127   : > { %v1845_v22 = vsel %vm410_vm2, %v1766_v35, %v1376_v19  ;;  %v1849_v23 = vsel %vm410_vm2, %v1769_v38, %v1377_v18  ;;  %v1852_v24 = vsel %vm410_vm2, %v793_v46, %v1381_v21  ;;  %v1855_v25 = vsel %vm410_vm2, %v794_v44, %v1382_v20 }
 0x128   : > { %2319 = vst [vmem:[#allocation4_spill] sm:$0xff] %v1852_v24  ;;  %v1385_v26 = vpop.permute.xlu1 %1384  ;;  %v1390_v27 = vpop.permute.xlu0 %1389  ;;  %v1443_v28 = vpack.i.bf16 %v1849_v23, %v1845_v22  ;;  %v1448_v29 = vpack.i.bf16 %v1855_v25, %v1852_v24  ;;  %v250_v19 = vunpack.c.l.bf16 %v246_v0  ;;  %v251_v21 = vunpack.c.l.bf16 %v247_v1 }
 0x129   : > { %v1387_v31 = vunpack.i.h.bf16 %v1385_v26  ;;  %v1386_v30 = vunpack.i.l.bf16 %v1385_v26  ;;  %v1392_v32 = vunpack.i.h.bf16 %v1390_v27  ;;  %v1391_v33 = vunpack.i.l.bf16 %v1390_v27 }
 0x12a   : > { %1444 = vrot.lane.b32.xlu1 %v1443_v28, %s1553_s25  ;;  %1449 = vrot.lane.b32.xlu0 %v1448_v29, %s1553_s25  ;;  %v274_v26 = vunpack.c.l.bf16 %v270_v3  ;;  %v275_v27 = vunpack.c.l.bf16 %v271_v42  ;;  %v298_v28 = vunpack.c.l.bf16 %v294_v54  ;;  %v299_v29 = vunpack.c.l.bf16 %v1923_v7 }
 0x12b   : > { %v1865_v35 = vsel %vm410_vm2, %v1778_v49, %v1386_v30  ;;  %v1869_v38 = vsel %vm410_vm2, %v1781_v50, %v1387_v31  ;;  %v1872_v39 = vsel %vm410_vm2, %v981_v58, %v1391_v33  ;;  %v1875_v40 = vsel %vm410_vm2, %v982_v59, %v1392_v32  ;;  %v245_v50 = vld [vmem:[%s1903_s4 + $0x8] sm:$0x1] }
 0x12c   : > { %2320 = vst [vmem:[#allocation5_spill] sm:$0xff] %v1865_v35  ;;  %2321 = vst [vmem:[#allocation6_spill] sm:$0xff] %v1869_v38  ;;  %v1395_v43 = vpop.permute.xlu1 %1394  ;;  %v1453_v36 = vpack.i.bf16 %v1869_v38, %v1865_v35  ;;  %v1458_v45 = vpack.i.bf16 %v1875_v40, %v1872_v39  ;;  %v252_v49 = vlaneseq  ;;  %v249_v58 = vunpack.c.l.bf16 %v245_v50 }
 0x12d   : > { %2322 = vst [vmem:[#allocation7_spill] sm:$0xff] %v1872_v39  ;;  %2323 = vst [vmem:[#allocation8_spill] sm:$0xff] %v1875_v40  ;;  %v1397_v37 = vunpack.i.h.bf16 %v1395_v43  ;;  %v1396_v46 = vunpack.i.l.bf16 %v1395_v43  ;;  %v272_v59 = vunpack.c.l.bf16 %v268_v51  ;;  %v322_v31 = vunpack.c.l.bf16 %v318_v14  ;;  %v700_v39 = vld [vmem:[%s1903_s4 + $0x1c] sm:$0x2]  ;;  %v724_v40 = vld [vmem:[%s1903_s4 + $0x1c] sm:$0x8] }
 0x12e   : > { %1454 = vrot.lane.b32.xlu1 %v1453_v36, %s1553_s25  ;;  %1459 = vrot.lane.b32.xlu0 %v1458_v45, %s1553_s25  ;;  %v323_v30 = vunpack.c.l.bf16 %v1927_v15  ;;  %v1946_v15 = vld [vmem:[%s1903_s4] sm:$0x2] }
 0x12f   : > { %v1885_v44 = vsel %vm410_vm2, %v1790_v61, %v1396_v46  ;;  %v1889_v47 = vsel %vm410_vm2, %v1793_v62, %v1397_v37  ;;  %v316_v61 = vld [vmem:[%s1903_s4 + $0x4] sm:$0x4]  ;;  %v317_v62 = vld [vmem:[%s1903_s4 + $0xc] sm:$0x4] }
 0x130   : > { %2324 = vst [vmem:[#allocation9_spill] sm:$0xff] %v1885_v44  ;;  %2325 = vst [vmem:[#allocation10_spill] sm:$0xff] %v1889_v47  ;;  %v1463_v48 = vpack.i.bf16 %v1889_v47, %v1885_v44  ;;  %v320_v5 = vunpack.c.l.bf16 %v316_v61  ;;  %v321_v6 = vunpack.c.l.bf16 %v317_v62 }
 0x132   : > { %1464 = vrot.lane.b32.xlu1 %v1463_v48, %s1553_s25  ;;  %1469 = vrot.lane.b32.xlu0 %v1728_v9, %s1552_s23  ;;  %v1905_v9 = vshrl.u32 %v252_v49, 7 }
 0x134   : > { %v254_v53 = vsub.s32 0, %v1905_v9  ;;  %v278_v55 = vsub.s32 4, %v1905_v9  ;;  %v463_v37 = vsub.s32 1, %v1905_v9 }
 0x136   : > { %1474 = vrot.lane.b32.xlu1 %v1733_v11, %s1552_s23  ;;  %v244_v11 = vld [vmem:[%s1903_s4] sm:$0x1]  ;;  %v259_v17 = vrot.slane %v249_v58, %v254_v53  ;;  %v279_v18 = vrot.slane %v272_v59, %v278_v55  ;;  %v283_v20 = vrot.slane %v273_v63, %v278_v55  ;;  %v303_v32 = vrot.slane %v296_v2, %v254_v53  ;;  %s1077_s23 = scalar_lea.vmem (%p1636_p9), %s2302_s2, %s1237_s21 }
 0x137   : > { %v248_v57 = vunpack.c.l.bf16 %v244_v11  ;;  %v307_v33 = vrot.slane %v297_v4, %v254_v53  ;;  %v327_v43 = vrot.slane %v320_v5, %v278_v55  ;;  %v331_v36 = vrot.slane %v321_v6, %v278_v55 }
 0x138   : > { %v263_v45 = vrot.slane %v250_v19, %v254_v53  ;;  %v267_v46 = vrot.slane %v251_v21, %v254_v53  ;;  %v287_v48 = vrot.slane %v274_v26, %v278_v55  ;;  %v291_v49 = vrot.slane %v275_v27, %v278_v55 }
 0x139   : > { %v255_v16 = vrot.slane %v248_v57, %v254_v53  ;;  %v479_v11 = vsub.s32 5, %v1905_v9  ;;  %v311_v50 = vrot.slane %v298_v28, %v254_v53  ;;  %v315_v51 = vrot.slane %v299_v29, %v254_v53 }
 0x13a   : > { %v335_v52 = vrot.slane %v322_v31, %v278_v55  ;;  %v339_v56 = vrot.slane %v323_v30, %v278_v55  ;;  %v1937_v61 = vsel %vm340_vm0, %v259_v17, %v283_v20  ;;  %v1940_v62 = vsel %vm340_vm0, %v303_v32, %v327_v43  ;;  %v1969_v20 = vld [vmem:[%s1903_s4 + $0x8] sm:$0x8]  ;;  %v1971_v32 = vpop.permute.xlu0 %1399 }
 0x13b   : > { %v1934_v60 = vsel %vm340_vm0, %v255_v16, %v279_v18  ;;  %v1943_v0 = vsel %vm340_vm0, %v307_v33, %v331_v36  ;;  %v464_v1 = vrot.slane %v248_v57, %v463_v37  ;;  %v468_v3 = vrot.slane %v249_v58, %v463_v37  ;;  %v1966_v18 = vld [vmem:[%s1903_s4] sm:$0x8] }
 0x13c   : > { %v496_v42 = vrot.slane %v296_v2, %v463_v37  ;;  %v500_v54 = vrot.slane %v297_v4, %v463_v37  ;;  %v480_v53 = vrot.slane %v272_v59, %v479_v11  ;;  %v484_v55 = vrot.slane %v273_v63, %v479_v11  ;;  %v1960_v2 = vpop.permute.xlu1 %1404 }
 0x13d   : > { %v512_v7 = vrot.slane %v320_v5, %v479_v11  ;;  %v516_v14 = vrot.slane %v321_v6, %v479_v11  ;;  %v1949_v16 = vsel %vm340_vm0, %v263_v45, %v287_v48  ;;  %v1952_v17 = vsel %vm340_vm0, %v267_v46, %v291_v49  ;;  %v1963_v6 = vld [vmem:[%s1903_s4 + $0x8] sm:$0x2] }
 0x13e   : > { %v1955_v57 = vsel %vm340_vm0, %v311_v50, %v335_v52  ;;  %v1958_v58 = vsel %vm340_vm0, %v315_v51, %v339_v56  ;;  %v472_v59 = vrot.slane %v250_v19, %v463_v37  ;;  %v476_v63 = vrot.slane %v251_v21, %v463_v37  ;;  %v2002_v51 = vld [vmem:[%s1903_s4 + $0x4] sm:$0x8]  ;;  %v2005_v52 = vld [vmem:[%s1903_s4 + $0xc] sm:$0x8] }
 0x13f   : > { %v488_v4 = vrot.slane %v274_v26, %v479_v11  ;;  %v492_v5 = vrot.slane %v275_v27, %v479_v11  ;;  %v504_v33 = vrot.slane %v298_v28, %v463_v37  ;;  %v520_v43 = vrot.slane %v322_v31, %v479_v11  ;;  %v1990_v28 = vld [vmem:[%s1903_s4 + $0x4] sm:$0x2]  ;;  %v1993_v31 = vld [vmem:[%s1903_s4 + $0xc] sm:$0x2] }
 0x140   : > { %v2303_v36 = vunpack.c.l.bf16 %v1946_v15  ;;  %v1975_v19 = vsub.s32 2, %v1905_v9  ;;  %v1978_v21 = vsel %vm340_vm0, %v464_v1, %v480_v53  ;;  %v1981_v26 = vsel %vm340_vm0, %v468_v3, %v484_v55 }
 0x141   : > { %v1984_v27 = vsel %vm340_vm0, %v496_v42, %v512_v7  ;;  %v1987_v45 = vsel %vm340_vm0, %v500_v54, %v516_v14  ;;  %v2304_v46 = vunpack.c.l.bf16 %v1963_v6  ;;  %v2306_v48 = vunpack.c.l.bf16 %v1966_v18  ;;  %v2014_v54 = vld [vmem:[%s1903_s4 + $0x10] sm:$0x2] }
 0x142   : > { %v2308_v49 = vunpack.c.l.bf16 %v1969_v20  ;;  %v1999_v50 = vsub.s32 6, %v1905_v9  ;;  %v508_v56 = vrot.slane %v299_v29, %v463_v37  ;;  %v524_v1 = vrot.slane %v323_v30, %v479_v11  ;;  %v2024_v30 = vpop.permute.xlu1 %1414 }
 0x143   : > { %v2008_v3 = vsel %vm340_vm0, %v472_v59, %v488_v4  ;;  %v2011_v42 = vsel %vm340_vm0, %v476_v63, %v492_v5  ;;  %v2019_v7 = vsel %vm340_vm0, %v504_v33, %v520_v43  ;;  %v660_v29 = vrot.slane %v2303_v36, %v1975_v19  ;;  %v2031_v63 = vld [vmem:[%s1903_s4 + $0x18] sm:$0x2]  ;;  %v2034_v4 = vld [vmem:[%s1903_s4 + $0x10] sm:$0x8]  ;;  %v2037_v5 = vld [vmem:[%s1903_s4 + $0x18] sm:$0x8]  ;;  %v2039_v33 = vpop.permute.xlu0 %1409 }
 0x144   : > { %2326 = vst [vmem:[#allocation11_spill] sm:$0xff] %v2008_v3  ;;  %2327 = vst [vmem:[#allocation12_spill] sm:$0xff] %v2011_v42  ;;  %v701_v37 = vunpack.c.l.bf16 %v1990_v28  ;;  %v702_v11 = vunpack.c.l.bf16 %v1993_v31  ;;  %v664_v43 = vrot.slane %v2304_v46, %v1975_v19  ;;  %v684_v28 = vrot.slane %v2306_v48, %v1999_v50  ;;  %v699_v46 = vld [vmem:[%s1903_s4 + $0x14] sm:$0x2] }
 0x145   : > { %2328 = vst [vmem:[#allocation13_spill] sm:$0xff] %v2019_v7  ;;  %v688_v31 = vrot.slane %v2308_v49, %v1999_v50  ;;  %v655_v55 = vunpack.c.l.bf16 %v2014_v54  ;;  %v2055_v14 = vsel %vm340_vm0, %v508_v56, %v524_v1  ;;  %v656_v48 = vunpack.c.l.bf16 %v2031_v63  ;;  %v723_v54 = vld [vmem:[%s1903_s4 + $0x14] sm:$0x8] }
 0x146   : > { %2329 = vst [vmem:[#allocation14_spill] sm:$0xff] %v2055_v14  ;;  %v679_v47 = vunpack.c.l.bf16 %v2034_v4  ;;  %v680_v49 = vunpack.c.l.bf16 %v2037_v5  ;;  %v708_v53 = vrot.slane %v701_v37, %v1975_v19  ;;  %v712_v36 = vrot.slane %v702_v11, %v1975_v19  ;;  %v2081_v38 = vpop.permute.xlu1 %1424 }
 0x147   : > { %v2330_v56 = vunpack.c.l.bf16 %v2002_v51  ;;  %v2331_v59 = vunpack.c.l.bf16 %v2005_v52  ;;  %v2075_v4 = vsel %vm340_vm0, %v660_v29, %v684_v28  ;;  %v2078_v5 = vsel %vm340_vm0, %v664_v43, %v688_v31  ;;  %2334 = vst [vmem:[#allocation17_spill] sm:$0xff] %v2081_v38  ;;  %v2083_v42 = vpop.permute.xlu0 %1419 }
 0x148   : > { %2332 = vst [vmem:[#allocation15_spill] sm:$0xff] %v2075_v4  ;;  %2333 = vst [vmem:[#allocation16_spill] sm:$0xff] %v2078_v5  ;;  %v668_v35 = vrot.slane %v655_v55, %v1975_v19  ;;  %v703_v7 = vunpack.c.l.bf16 %v699_v46  ;;  %v727_v3 = vunpack.c.l.bf16 %v723_v54  ;;  %v728_v14 = vunpack.c.l.bf16 %v724_v40 }
 0x149   : > { %v732_v1 = vrot.slane %v2330_v56, %v1999_v50  ;;  %v736_v44 = vrot.slane %v2331_v59, %v1999_v50  ;;  %v704_v56 = vunpack.c.l.bf16 %v700_v39  ;;  %2335 = vst [vmem:[#allocation18_spill] sm:$0xff] %v2083_v42  ;;  %v672_v59 = vrot.slane %v656_v48, %v1975_v19 }
 0x14a   : > { %v692_v63 = vrot.slane %v679_v47, %v1999_v50  ;;  %v696_v29 = vrot.slane %v680_v49, %v1999_v50  ;;  %v871_v43 = vsub.s32 3, %v1905_v9  ;;  %v887_v39 = vsub.s32 7, %v1905_v9 }
 0x14b   : > { %v2096_v54 = vsel %vm340_vm0, %v708_v53, %v732_v1  ;;  %v2099_v5 = vsel %vm340_vm0, %v712_v36, %v736_v44  ;;  %v716_v24 = vrot.slane %v703_v7, %v1975_v19  ;;  %v720_v28 = vrot.slane %v704_v56, %v1975_v19 }
 0x14c   : > { %2336 = vst [vmem:[#allocation19_spill] sm:$0xff] %v2096_v54  ;;  %2337 = vst [vmem:[#allocation20_spill] sm:$0xff] %v2099_v5  ;;  %v740_v31 = vrot.slane %v727_v3, %v1999_v50  ;;  %v744_v4 = vrot.slane %v728_v14, %v1999_v50  ;;  %v2106_v9 = vsel %vm340_vm0, %v668_v35, %v692_v63  ;;  %v2340_v53 = vunpack.c.l.bf16 %v1946_v15 }
 0x14d   : > { %2338 = vst [vmem:[#allocation21_spill] sm:$0xff] %v2106_v9  ;;  %v2109_v40 = vsel %vm340_vm0, %v672_v59, %v696_v29  ;;  %v2341_v44 = vunpack.c.l.bf16 %v1963_v6  ;;  %v2342_v46 = vunpack.c.l.bf16 %v1966_v18  ;;  %v2343_v19 = vunpack.c.l.bf16 %v1969_v20 }
 0x14e   : > { %2339 = vst [vmem:[#allocation22_spill] sm:$0xff] %v2109_v40  ;;  %v872_v1 = vrot.slane %v2340_v53, %v871_v43  ;;  %v904_v5 = vrot.slane %v701_v37, %v871_v43  ;;  %v908_v50 = vrot.slane %v702_v11, %v871_v43  ;;  %v2344_v35 = vunpack.c.l.bf16 %v2002_v51 }
 0x14f   : > { %v876_v36 = vrot.slane %v2341_v44, %v871_v43  ;;  %v888_v38 = vrot.slane %v2342_v46, %v887_v39  ;;  %v892_v54 = vrot.slane %v2343_v19, %v887_v39  ;;  %v2345_v59 = vunpack.c.l.bf16 %v2005_v52 }
 0x150   : > { %v920_v63 = vrot.slane %v2344_v35, %v887_v39  ;;  %v880_v15 = vrot.slane %v655_v55, %v871_v43  ;;  %v884_v53 = vrot.slane %v656_v48, %v871_v43  ;;  %v896_v44 = vrot.slane %v679_v47, %v887_v39 }
 0x151   : > { %v924_v29 = vrot.slane %v2345_v59, %v887_v39  ;;  %v900_v40 = vrot.slane %v680_v49, %v887_v39  ;;  %v2124_v18 = vsel %vm340_vm0, %v716_v24, %v740_v31  ;;  %v2127_v20 = vsel %vm340_vm0, %v720_v28, %v744_v4 }
 0x152   : > { %v912_v37 = vrot.slane %v703_v7, %v871_v43  ;;  %v916_v11 = vrot.slane %v704_v56, %v871_v43  ;;  %v928_v55 = vrot.slane %v727_v3, %v887_v39  ;;  %v932_v48 = vrot.slane %v728_v14, %v887_v39 }
 0x153   : > { %v2137_v31 = vsel %vm340_vm0, %v872_v1, %v888_v38  ;;  %v2140_v7 = vsel %vm340_vm0, %v876_v36, %v892_v54  ;;  %v2143_v4 = vsel %vm340_vm0, %v904_v5, %v920_v63  ;;  %v2149_v3 = vsel %vm340_vm0, %v908_v50, %v924_v29 }
 0x154   : > { %v2152_v14 = vsel %vm340_vm0, %v880_v15, %v896_v44  ;;  %v2155_v56 = vsel %vm340_vm0, %v884_v53, %v900_v40  ;;  %v2163_v54 = vsel %vm340_vm0, %v916_v11, %v932_v48  ;;  %v2348_v50 = vunpack.i.h.bf16 %v1960_v2 }
 0x155   : > { %v2349_v63 = vunpack.i.l.bf16 %v1960_v2 }
 0x194   : > { %v1430_v42 = vpop.permute.xlu0 %1429 }
 0x195   : > { %v1432_v9 = vunpack.i.h.bf16 %v1430_v42  ;;  %v1431_v6 = vunpack.i.l.bf16 %v1430_v42  ;;  %v2346_v42 = vunpack.i.h.bf16 %v1971_v32 }
 0x197   : > { %v433_v51 = vsel %vm431_vm3, %v1818_v41, %v1432_v9  ;;  %v432_v52 = vsel %vm431_vm3, %v1814_v34, %v1431_v6  ;;  %v2347_v41 = vunpack.i.l.bf16 %v1971_v32  ;;  %v2160_v32 = vsel %vm340_vm0, %v912_v37, %v928_v55 }
 0x198   : > { %v450_v47 = vsel %vm448_vm4, %v433_v51, %v2346_v42  ;;  %v1435_v49 = vpop.permute.xlu1 %1434  ;;  %v1440_v24 = vpop.permute.xlu0 %1439 }
 0x199   : > { %v449_v34 = vsel %vm448_vm4, %v432_v52, %v2347_v41  ;;  %v1437_v38 = vunpack.i.h.bf16 %v1435_v49  ;;  %v1436_v43 = vunpack.i.l.bf16 %v1435_v49  ;;  %v1442_v28 = vunpack.i.h.bf16 %v1440_v24 }
 0x19a   : > { %v1441_v39 = vunpack.i.l.bf16 %v1440_v24  ;;  %v455_v5 = vmul.f32 %v450_v47, %v1937_v61  ;;  %v456_v46 = vmul.f32 %v450_v47, %v1943_v0  ;;  %v453_v19 = vmul.f32 %v449_v34, %v1934_v60  ;;  %v2355_v24 = vld [vmem:[#allocation18_spill] sm:$0xff] }
 0x19b   : > { %v435_v9 = vsel %vm431_vm3, %v1827_v10, %v1437_v38  ;;  %v434_v40 = vsel %vm431_vm3, %v1824_v8, %v1436_v43  ;;  %v614_v1 = vsel %vm431_vm3, %v1835_v13, %v1442_v28  ;;  %v2350_v8 = vunpack.i.l.bf16 %v2039_v33  ;;  %v2359_v43 = vld [vmem:[#allocation14_spill] sm:$0xff] }
 0x19c   : > { %v613_v61 = vsel %vm431_vm3, %v1831_v12, %v1441_v39  ;;  %v1445_v36 = vpop.permute.xlu1 %1444  ;;  %v1450_v0 = vpop.permute.xlu0 %1449  ;;  %v452_v35 = vsel %vm448_vm4, %v435_v9, %v2348_v50  ;;  %v451_v10 = vsel %vm448_vm4, %v434_v40, %v2349_v63  ;;  %v454_v13 = vmul.f32 %v449_v34, %v1940_v62  ;;  %v2360_v39 = vld [vmem:[#allocation11_spill] sm:$0xff]  ;;  %v2361_v40 = vld [vmem:[#allocation13_spill] sm:$0xff]  ;;  %v2363_v50 = vld [vmem:[#allocation20_spill] sm:$0xff] }
 0x19d   : > { %v629_v59 = vsel %vm448_vm4, %v613_v61, %v2350_v8  ;;  %v459_v12 = vmul.f32 %v452_v35, %v1952_v17  ;;  %v460_v29 = vmul.f32 %v452_v35, %v1958_v58  ;;  %v2351_v60 = vunpack.i.h.bf16 %v2039_v33  ;;  %v2364_v8 = vld [vmem:[#allocation15_spill] sm:$0xff] }
 0x19e   : > { %v457_v53 = vmul.f32 %v451_v10, %v1949_v16  ;;  %v458_v2 = vmul.f32 %v451_v10, %v1955_v57  ;;  %v633_v6 = vmul.f32 %v629_v59, %v1978_v21  ;;  %v634_v44 = vmul.f32 %v629_v59, %v1984_v27  ;;  %v2352_v27 = vld [vmem:[#allocation4_spill] sm:$0xff] }
 0x19f   : > { %v630_v15 = vsel %vm448_vm4, %v614_v1, %v2351_v60  ;;  %v1447_v37 = vunpack.i.h.bf16 %v1445_v36  ;;  %v1446_v11 = vunpack.i.l.bf16 %v1445_v36  ;;  %v1452_v51 = vunpack.i.h.bf16 %v1450_v0 }
 0x1a0   : > { %v1451_v62 = vunpack.i.l.bf16 %v1450_v0  ;;  %v1455_v52 = vpop.permute.xlu1 %1454  ;;  %v1460_v17 = vpop.permute.xlu0 %1459  ;;  %v635_v58 = vmul.f32 %v630_v15, %v1981_v26  ;;  %v636_v33 = vmul.f32 %v630_v15, %v1987_v45  ;;  %v641_v55 = vadd.f32 %v633_v6, %v453_v19  ;;  %v2362_v0 = vld [vmem:[#allocation16_spill] sm:$0xff] }
 0x1a1   : > { %v642_v48 = vadd.f32 %v634_v44, %v454_v13  ;;  %v616_v16 = vsel %vm431_vm3, %v1849_v23, %v1447_v37  ;;  %v615_v57 = vsel %vm431_vm3, %v1845_v22, %v1446_v11  ;;  %v834_v21 = vsel %vm431_vm3, %v1855_v25, %v1452_v51  ;;  %v2358_v25 = vld [vmem:[#allocation12_spill] sm:$0xff]  ;;  %v2365_v13 = vld [vmem:[#allocation19_spill] sm:$0xff] }
 0x1a2   : > { %v833_v42 = vsel %vm431_vm3, %v2352_v27, %v1451_v62  ;;  %v2353_v47 = vunpack.i.h.bf16 %v2024_v30  ;;  %v2354_v45 = vunpack.i.l.bf16 %v2024_v30  ;;  %v2356_v41 = vunpack.i.h.bf16 %v2355_v24 }
 0x1a3   : > { %v2357_v22 = vunpack.i.l.bf16 %v2355_v24  ;;  %v643_v30 = vadd.f32 %v635_v58, %v455_v5  ;;  %v644_v36 = vadd.f32 %v636_v33, %v456_v46  ;;  %v1457_v6 = vunpack.i.h.bf16 %v1455_v52  ;;  %v2366_v58 = vld [vmem:[#allocation6_spill] sm:$0xff] }
 0x1a4   : > { %v632_v26 = vsel %vm448_vm4, %v616_v16, %v2353_v47  ;;  %v631_v49 = vsel %vm448_vm4, %v615_v57, %v2354_v45  ;;  %v850_v23 = vsel %vm448_vm4, %v834_v21, %v2356_v41  ;;  %v1465_v61 = vpop.permute.xlu1 %1464  ;;  %v1470_v15 = vpop.permute.xlu0 %1469  ;;  %v1456_v44 = vunpack.i.l.bf16 %v1455_v52  ;;  %v2368_v21 = vld [vmem:[#allocation17_spill] sm:$0xff]  ;;  %v2372_v47 = vld [vmem:[#allocation7_spill] sm:$0xff] }
 0x1a5   : > { %v849_v34 = vsel %vm448_vm4, %v833_v42, %v2357_v22  ;;  %v639_v38 = vmul.f32 %v632_v26, %v2358_v25  ;;  %v640_v28 = vmul.f32 %v632_v26, %v2359_v43  ;;  %v637_v9 = vmul.f32 %v631_v49, %v2360_v39 }
 0x1a6   : > { %v638_v1 = vmul.f32 %v631_v49, %v2361_v40  ;;  %v855_v19 = vmul.f32 %v850_v23, %v2362_v0  ;;  %v856_v35 = vmul.f32 %v850_v23, %v2363_v50  ;;  %v853_v59 = vmul.f32 %v849_v34, %v2364_v8  ;;  %v2373_v49 = vld [vmem:[#allocation22_spill] sm:$0xff]  ;;  %v2374_v23 = vld [vmem:[#allocation21_spill] sm:$0xff] }
 0x1a7   : > { %v645_v63 = vadd.f32 %v637_v9, %v457_v53  ;;  %v854_v60 = vmul.f32 %v849_v34, %v2365_v13  ;;  %v1462_v37 = vunpack.i.h.bf16 %v1460_v17  ;;  %v1461_v11 = vunpack.i.l.bf16 %v1460_v17  ;;  %v2367_v53 = vld [vmem:[#allocation5_spill] sm:$0xff] }
 0x1a8   : > { %v646_v10 = vadd.f32 %v638_v1, %v458_v2  ;;  %v647_v51 = vadd.f32 %v639_v38, %v459_v12  ;;  %v648_v5 = vadd.f32 %v640_v28, %v460_v29  ;;  %v1467_v46 = vunpack.i.h.bf16 %v1465_v61  ;;  %v2371_v29 = vld [vmem:[#allocation8_spill] sm:$0xff]  ;;  %v1475_v45 = vpop.permute.xlu1 %1474 }
 0x1a9   : > { %v1466_v62 = vunpack.i.l.bf16 %v1465_v61  ;;  %v836_v33 = vsel %vm431_vm3, %v2366_v58, %v1457_v6  ;;  %v835_v2 = vsel %vm431_vm3, %v2367_v53, %v1456_v44  ;;  %v1472_v16 = vunpack.i.h.bf16 %v1470_v15 }
 0x1aa   : > { %v1471_v57 = vunpack.i.l.bf16 %v1470_v15  ;;  %v2369_v27 = vunpack.i.h.bf16 %v2368_v21  ;;  %v2370_v17 = vunpack.i.l.bf16 %v2368_v21  ;;  %v1022_v42 = vsel %vm431_vm3, %v2371_v29, %v1462_v37 }
 0x1ab   : > { %v1021_v26 = vsel %vm431_vm3, %v2372_v47, %v1461_v11  ;;  %v861_v25 = vadd.f32 %v853_v59, %v641_v55  ;;  %v862_v38 = vadd.f32 %v854_v60, %v642_v48  ;;  %v863_v43 = vadd.f32 %v855_v19, %v643_v30  ;;  %v2376_v48 = vld [vmem:[#allocation9_spill] sm:$0xff] }
 0x1ac   : > { %v852_v52 = vsel %vm448_vm4, %v836_v33, %v2369_v27  ;;  %v851_v12 = vsel %vm448_vm4, %v835_v2, %v2370_v17  ;;  %v864_v28 = vadd.f32 %v856_v35, %v644_v36  ;;  %v1037_v39 = vsel %vm448_vm4, %v1021_v26, %v1471_v57 }
 0x1ad   : > { %v859_v24 = vmul.f32 %v852_v52, %v2373_v49  ;;  %v860_v41 = vmul.f32 %v852_v52, %v2127_v20  ;;  %v857_v22 = vmul.f32 %v851_v12, %v2374_v23  ;;  %v858_v34 = vmul.f32 %v851_v12, %v2124_v18  ;;  %v2375_v18 = vld [vmem:[#allocation10_spill] sm:$0xff] }
 0x1ae   : > { %v1038_v9 = vsel %vm448_vm4, %v1022_v42, %v1472_v16  ;;  %v1477_v40 = vunpack.i.h.bf16 %v1475_v45  ;;  %v1476_v1 = vunpack.i.l.bf16 %v1475_v45  ;;  %v1041_v61 = vmul.f32 %v1037_v39, %v2137_v31 }
 0x1af   : > { %v1042_v0 = vmul.f32 %v1037_v39, %v2143_v4  ;;  %v1043_v20 = vmul.f32 %v1038_v9, %v2140_v7  ;;  %v1044_v50 = vmul.f32 %v1038_v9, %v2149_v3  ;;  %v1024_v55 = vsel %vm431_vm3, %v2375_v18, %v1467_v46 }
 0x1b0   : > { %v1023_v30 = vsel %vm431_vm3, %v2376_v48, %v1466_v62  ;;  %v865_v36 = vadd.f32 %v857_v22, %v645_v63  ;;  %v866_v19 = vadd.f32 %v858_v34, %v646_v10  ;;  %v1049_v35 = vadd.f32 %v1041_v61, %v861_v25 }
 0x1b1   : > { %v1050_v8 = vadd.f32 %v1042_v0, %v862_v38  ;;  %v1051_v59 = vadd.f32 %v1043_v20, %v863_v43  ;;  %v1052_v13 = vadd.f32 %v1044_v50, %v864_v28  ;;  %v867_v60 = vadd.f32 %v859_v24, %v647_v51 }
 0x1b2   : > { %v868_v31 = vadd.f32 %v860_v41, %v648_v5  ;;  %v1039_v4 = vsel %vm448_vm4, %v1023_v30, %v1476_v1  ;;  %v1040_v7 = vsel %vm448_vm4, %v1024_v55, %v1477_v40  ;;  %1058 = vst.msk [vmem:[%s238_s6] sm:$0xff] %vm1057_vm5, %v1049_v35 }
 0x1b3   : > { %1059 = vst.msk [vmem:[%s238_s6 + $0x8] sm:$0xff] %vm1057_vm5, %v1050_v8  ;;  %1060 = vst.msk [vmem:[%s238_s6 + $0x10] sm:$0xff] %vm1057_vm5, %v1051_v59  ;;  %v1045_v3 = vmul.f32 %v1039_v4, %v2152_v14  ;;  %v1046_v63 = vmul.f32 %v1039_v4, %v2160_v32  ;;  %v1047_v10 = vmul.f32 %v1040_v7, %v2155_v56 }
 0x1b4   : > { %1061 = vst.msk [vmem:[%s238_s6 + $0x18] sm:$0xff] %vm1057_vm5, %v1052_v13  ;;  %v1048_v15 = vmul.f32 %v1040_v7, %v2163_v54  ;;  %1072 = sbr.rel (!%p1636_p9) target bundleno = 449 (0x1c1), region = 73 }
 0x1b5   : > { %v1053_v6 = vadd.f32 %v1045_v3, %v865_v36  ;;  %v1054_v44 = vadd.f32 %v1046_v63, %v866_v19  ;;  %v1055_v37 = vadd.f32 %v1047_v10, %v867_v60 }
 0x1b6   : > { %v1056_v11 = vadd.f32 %v1048_v15, %v868_v31 }
 0x1b7   : > { %1062 = vst.msk [vmem:[%s238_s6 + $0x20] sm:$0xff] %vm1057_vm5, %v1053_v6  ;;  %1063 = vst.msk [vmem:[%s238_s6 + $0x28] sm:$0xff] %vm1057_vm5, %v1054_v44 }
 0x1b8   : > { %1064 = vst.msk [vmem:[%s238_s6 + $0x30] sm:$0xff] %vm1057_vm5, %v1055_v37  ;;  %1065 = vst.msk [vmem:[%s238_s6 + $0x38] sm:$0xff] %vm1057_vm5, %v1056_v11 }
 0x1b9   : > { %v1120_v14 = vld [vmem:[%s238_s6] sm:$0xff] }
 0x1ba   : > { %v1122_v56 = vld [vmem:[%s238_s6 + $0x8] sm:$0xff]  ;;  %v1124_v32 = vld [vmem:[%s238_s6 + $0x10] sm:$0xff]  ;;  %1121 = vst [vmem:[%s1077_s23] sm:$0xff] %v1120_v14 }
 0x1bb   : > { %v1126_v54 = vld [vmem:[%s238_s6 + $0x18] sm:$0xff]  ;;  %1123 = vst [vmem:[%s1077_s23 + $0x8] sm:$0xff] %v1122_v56  ;;  %1125 = vst [vmem:[%s1077_s23 + $0x40] sm:$0xff] %v1124_v32 }
 0x1bc   : > { %1127 = vst [vmem:[%s1077_s23 + $0x48] sm:$0xff] %v1126_v54 }
 0x1be   : > { %v1128_v51 = vld [vmem:[%s238_s6 + $0x20] sm:$0xff]  ;;  %v1130_v5 = vld [vmem:[%s238_s6 + $0x28] sm:$0xff] }
 0x1bf   : > { %v1132_v46 = vld [vmem:[%s238_s6 + $0x30] sm:$0xff]  ;;  %v1134_v62 = vld [vmem:[%s238_s6 + $0x38] sm:$0xff]  ;;  %1129 = vst [vmem:[%s1077_s23 + $0x80] sm:$0xff] %v1128_v51  ;;  %1131 = vst [vmem:[%s1077_s23 + $0x88] sm:$0xff] %v1130_v5 }
 0x1c0   : > { %1133 = vst [vmem:[%s1077_s23 + $0xc0] sm:$0xff] %v1132_v46  ;;  %1135 = vst [vmem:[%s1077_s23 + $0xc8] sm:$0xff] %v1134_v62 }
 0x1c1 PF: > { %s12_s17 = sadd.s32 1, %s1548_s17   ;;  %s2377_s9 = smov %s1520_s10 }
 0x1c2   : > { %p9_p1 = scmp.ge.s32.totalorder %s12_s17, 10   ;;  %s2378_s10 = smov %s1641_s28 }
 0x1c3   : > { %s2379_s11 = smov %s1528_s12  ;;  %s2380_s12 = smov %s1630_s24 }
 0x1c4   : > { %s2381_s13 = smov %s1540_s15  ;;  %s2382_s14 = smov %s1544_s16 }
 0x1c5   : > { %s2383_s15 = smov %s2386_s19  ;;  %s2384_s16 = smov %s2390_s20 }
 0x1c6   :  { %11 = sbr.rel (!%p9_p1) target bundleno = 5 (0x5), region = 145 }

</bundles_post_ra>
